<compile_context>
chip_gen: v6e
topology: v6e:2x2x1
jax: 0.10.0
libtpu: 0.0.40
codegen_flags: <defaults>
</compile_context>

<pallas_src>
import functools

import jax
import jax.numpy as jnp
from jax.experimental import pallas as pl
from jax.experimental.pallas import tpu as pltpu

HIDDEN = 64
SUBLANES = 8


def _round_up(n, m):
    return ((n + m - 1) // m) * m


def _default_tanh_dtype():
    """bf16 tanh on v6e/v7x (bf16 EUP), f32 everywhere else (v5e and older)."""
    try:
        kind = jax.devices()[0].device_kind.lower()
    except Exception:
        kind = ""
    if ("v6" in kind) or ("v7" in kind):
        return jnp.bfloat16
    return jnp.float32


def trpo_actor_kernel(x_ref, w1_ref, b1_ref, w2_ref, b2_ref, w3_ref, b3_ref,
                      mean_ref, *, tanh_dtype):
    # In-kernel cast of x (f32 in HBM -> matmul dtype); rides the VPU slot.
    x = x_ref[...].astype(w1_ref.dtype)
    a1 = jnp.dot(x, w1_ref[...], preferred_element_type=jnp.float32) + b1_ref[...]
    h1 = jnp.tanh(a1.astype(tanh_dtype)).astype(w2_ref.dtype)
    a2 = jnp.dot(h1, w2_ref[...], preferred_element_type=jnp.float32) + b2_ref[...]
    h2 = jnp.tanh(a2.astype(tanh_dtype)).astype(w3_ref.dtype)
    mean = jnp.dot(h2, w3_ref[...], preferred_element_type=jnp.float32) + b3_ref[...]
    mean_ref[...] = mean.astype(mean_ref.dtype)


def prepare_params(w1, b1, w2, b2, w3, b3, matmul_dtype=jnp.bfloat16):
    """One-time parameter prep (cast weights for the MXU, biases stay f32).

    Call this when parameters are created/updated, NOT on every forward pass.
    """
    return (
        w1.astype(matmul_dtype), b1.reshape(1, -1).astype(jnp.float32),
        w2.astype(matmul_dtype), b2.reshape(1, -1).astype(jnp.float32),
        w3.astype(matmul_dtype), b3.reshape(1, -1).astype(jnp.float32),
    )


def trpo_actor_forward(x, prepared_params, log_std, *, tile_b=2048,
                       tanh_dtype=None):
    w1, b1, w2, b2, w3, b3 = prepared_params
    if tanh_dtype is None:
        tanh_dtype = _default_tanh_dtype()

    B, obs_dim = x.shape
    act_dim = w3.shape[1]

    # Tile selection: multiple of 8 sublanes; for large batches cap at ~B/2 so
    # the grid has >=2 steps (v7x megacore split). No explicit batch padding:
    # the last (partial) block is masked by Pallas.
    eff_tile = min(tile_b, _round_up(B, SUBLANES))
    if B > 2 * SUBLANES:
        eff_tile = min(eff_tile, _round_up(pl.cdiv(B, 2), SUBLANES))
    eff_tile = max(eff_tile, SUBLANES)
    grid = (pl.cdiv(B, eff_tile),)

    flops = 2 * B * (obs_dim * HIDDEN + HIDDEN * HIDDEN + HIDDEN * act_dim)
    bytes_in = (x.size * x.dtype.itemsize
                + sum(a.size * a.dtype.itemsize
                      for a in (w1, b1, w2, b2, w3, b3)))
    bytes_out = B * act_dim * 4

    mean = pl.pallas_call(
        functools.partial(trpo_actor_kernel, tanh_dtype=tanh_dtype),
        out_shape=jax.ShapeDtypeStruct((B, act_dim), jnp.float32),
        grid=grid,
        in_specs=[
            pl.BlockSpec((eff_tile, obs_dim), lambda i: (i, 0)),  # x tile (pipelined)
            pl.BlockSpec((obs_dim, HIDDEN), lambda i: (0, 0)),    # W1 (VMEM-resident)
            pl.BlockSpec((1, HIDDEN), lambda i: (0, 0)),          # b1
            pl.BlockSpec((HIDDEN, HIDDEN), lambda i: (0, 0)),     # W2
            pl.BlockSpec((1, HIDDEN), lambda i: (0, 0)),          # b2
            pl.BlockSpec((HIDDEN, act_dim), lambda i: (0, 0)),    # W3
            pl.BlockSpec((1, act_dim), lambda i: (0, 0)),         # b3
        ],
        out_specs=pl.BlockSpec((eff_tile, act_dim), lambda i: (i, 0)),
        compiler_params=pltpu.CompilerParams(
            dimension_semantics=("parallel",)),
        cost_estimate=pl.CostEstimate(
            flops=flops,
            transcendentals=2 * B * HIDDEN,
            bytes_accessed=bytes_in + bytes_out),
    )(x, w1, b1, w2, b2, w3, b3)

    # std is x-independent: exp once, broadcast to mean's shape (matches
    # torch.exp(log_std).expand_as(mean)).
    std = jnp.broadcast_to(jnp.exp(log_std), mean.shape)
    return mean, std


def init_params(key, obs_dim, act_dim):
    """Deterministic init mimicking nn.Linear's U(-1/sqrt(fan_in), 1/sqrt(fan_in))."""
    ks = jax.random.split(key, 6)

    def linear(kw, kb, fan_in, fan_out):
        bound = 1.0 / jnp.sqrt(fan_in)
        w = jax.random.uniform(kw, (fan_in, fan_out), jnp.float32, -bound, bound)
        b = jax.random.uniform(kb, (fan_out,), jnp.float32, -bound, bound)
        return w, b

    w1, b1 = linear(ks[0], ks[1], obs_dim, HIDDEN)
    w2, b2 = linear(ks[2], ks[3], HIDDEN, HIDDEN)
    w3, b3 = linear(ks[4], ks[5], HIDDEN, act_dim)
    log_std = jnp.zeros((act_dim,), jnp.float32)  # nn.Parameter(torch.zeros(act_dim))
    return w1, b1, w2, b2, w3, b3, log_std


def reference_forward(x, w1, b1, w2, b2, w3, b3, log_std):
    h1 = jnp.tanh(x @ w1 + b1)
    h2 = jnp.tanh(h1 @ w2 + b2)
    mean = h2 @ w3 + b3
    std = jnp.broadcast_to(jnp.exp(log_std), mean.shape)
    return mean, std


if __name__ == "__main__":
    key = jax.random.PRNGKey(0)
    k_x, k_p = jax.random.split(key)

    batch, obs_dim, act_dim = 8, 16, 8
    x = jax.random.normal(k_x, (batch, obs_dim), jnp.float32)
    w1, b1, w2, b2, w3, b3, log_std = init_params(k_p, obs_dim, act_dim)

    # One-time parameter prep (hoisted out of the forward call).
    prepared = prepare_params(w1, b1, w2, b2, w3, b3)

    fwd = jax.jit(trpo_actor_forward)
    mean, std = fwd(x, prepared, log_std)
    jax.block_until_ready((mean, std))

    ref_mean, ref_std = reference_forward(x, w1, b1, w2, b2, w3, b3, log_std)
    assert mean.shape == (batch, act_dim) and std.shape == (batch, act_dim)
    # bf16 matmul operands (f32 accumulation) -> loosened tolerance vs f32 ref.
    assert jnp.allclose(mean, ref_mean, atol=5e-2, rtol=5e-2)
    assert jnp.allclose(std, ref_std, atol=1e-6, rtol=1e-6)

    print("KERNEL_OK")
</pallas_src>

<mosaic_0001>
module attributes {stable_mosaic.version = 11 : i64} {
  func.func @trpo_actor_kernel(%arg0: i32, %arg1: memref<8x16xf32, #tpu.memory_space<vmem>>, %arg2: memref<16x64xbf16, #tpu.memory_space<vmem>>, %arg3: memref<1x64xf32, #tpu.memory_space<vmem>>, %arg4: memref<64x64xbf16, #tpu.memory_space<vmem>>, %arg5: memref<1x64xf32, #tpu.memory_space<vmem>>, %arg6: memref<64x8xbf16, #tpu.memory_space<vmem>>, %arg7: memref<1x8xf32, #tpu.memory_space<vmem>>, %arg8: memref<8x8xf32, #tpu.memory_space<vmem>>) attributes {dimension_semantics = [#tpu.dimension_semantics<parallel>], iteration_bounds = array<i64: 1>, scalar_prefetch = 0 : i64, scratch_operands = 0 : i64, tpu.core_type = #tpu.core_type<tc>, window_params = [{transform_indices = @transform_0, window_bounds = array<i64: 8, 16>}, {pipeline_mode = #tpu.pipeline_mode<synchronous>, transform_indices = @transform_1, window_bounds = array<i64: 16, 64>}, {pipeline_mode = #tpu.pipeline_mode<synchronous>, transform_indices = @transform_2, window_bounds = array<i64: 1, 64>}, {pipeline_mode = #tpu.pipeline_mode<synchronous>, transform_indices = @transform_3, window_bounds = array<i64: 64, 64>}, {pipeline_mode = #tpu.pipeline_mode<synchronous>, transform_indices = @transform_4, window_bounds = array<i64: 1, 64>}, {pipeline_mode = #tpu.pipeline_mode<synchronous>, transform_indices = @transform_5, window_bounds = array<i64: 64, 8>}, {pipeline_mode = #tpu.pipeline_mode<synchronous>, transform_indices = @transform_6, window_bounds = array<i64: 1, 8>}, {transform_indices = @transform_7, window_bounds = array<i64: 8, 8>}]} {
    %c0 = arith.constant 0 : index
    %c0_0 = arith.constant 0 : index
    %0 = vector.load %arg1[%c0, %c0_0] : memref<8x16xf32, #tpu.memory_space<vmem>>, vector<8x16xf32>
    %1 = arith.truncf %0 : vector<8x16xf32> to vector<8x16xbf16>
    %c0_1 = arith.constant 0 : index
    %c0_2 = arith.constant 0 : index
    %2 = vector.load %arg2[%c0_1, %c0_2] : memref<16x64xbf16, #tpu.memory_space<vmem>>, vector<16x64xbf16>
    %cst = arith.constant dense<0.000000e+00> : vector<8x64xf32>
    %3 = tpu.matmul %1, %2, %cst {dimension_numbers = #tpu.dot_dimension_numbers<[1], [0], [0], [1], [0, 0, 1, 1], [], []>} : vector<8x16xbf16>, vector<16x64xbf16>, vector<8x64xf32> -> vector<8x64xf32>
    %c0_3 = arith.constant 0 : index
    %c0_4 = arith.constant 0 : index
    %4 = vector.load %arg3[%c0_3, %c0_4] : memref<1x64xf32, #tpu.memory_space<vmem>>, vector<1x64xf32>
    %5 = vector.broadcast %4 : vector<1x64xf32> to vector<8x64xf32>
    %6 = arith.addf %3, %5 : vector<8x64xf32>
    %7 = math.tanh %6 : vector<8x64xf32>
    %8 = arith.truncf %7 : vector<8x64xf32> to vector<8x64xbf16>
    %c0_5 = arith.constant 0 : index
    %c0_6 = arith.constant 0 : index
    %9 = vector.load %arg4[%c0_5, %c0_6] : memref<64x64xbf16, #tpu.memory_space<vmem>>, vector<64x64xbf16>
    %cst_7 = arith.constant dense<0.000000e+00> : vector<8x64xf32>
    %10 = tpu.matmul %8, %9, %cst_7 {dimension_numbers = #tpu.dot_dimension_numbers<[1], [0], [0], [1], [0, 0, 1, 1], [], []>} : vector<8x64xbf16>, vector<64x64xbf16>, vector<8x64xf32> -> vector<8x64xf32>
    %c0_8 = arith.constant 0 : index
    %c0_9 = arith.constant 0 : index
    %11 = vector.load %arg5[%c0_8, %c0_9] : memref<1x64xf32, #tpu.memory_space<vmem>>, vector<1x64xf32>
    %12 = vector.broadcast %11 : vector<1x64xf32> to vector<8x64xf32>
    %13 = arith.addf %10, %12 : vector<8x64xf32>
    %14 = math.tanh %13 : vector<8x64xf32>
    %15 = arith.truncf %14 : vector<8x64xf32> to vector<8x64xbf16>
    %c0_10 = arith.constant 0 : index
    %c0_11 = arith.constant 0 : index
    %16 = vector.load %arg6[%c0_10, %c0_11] : memref<64x8xbf16, #tpu.memory_space<vmem>>, vector<64x8xbf16>
    %cst_12 = arith.constant dense<0.000000e+00> : vector<8x8xf32>
    %17 = tpu.matmul %15, %16, %cst_12 {dimension_numbers = #tpu.dot_dimension_numbers<[1], [0], [0], [1], [0, 0, 1, 1], [], []>} : vector<8x64xbf16>, vector<64x8xbf16>, vector<8x8xf32> -> vector<8x8xf32>
    %c0_13 = arith.constant 0 : index
    %c0_14 = arith.constant 0 : index
    %18 = vector.load %arg7[%c0_13, %c0_14] : memref<1x8xf32, #tpu.memory_space<vmem>>, vector<1x8xf32>
    %19 = vector.broadcast %18 : vector<1x8xf32> to vector<8x8xf32>
    %20 = arith.addf %17, %19 : vector<8x8xf32>
    %c0_15 = arith.constant 0 : index
    %c0_16 = arith.constant 0 : index
    %21 = vector.load %arg8[%c0_15, %c0_16] : memref<8x8xf32, #tpu.memory_space<vmem>>, vector<8x8xf32>
    tpu.vector_store %arg8[%c0_15, %c0_16], %20 {strides = array<i32>} : memref<8x8xf32, #tpu.memory_space<vmem>>, vector<8x8xf32>,
    return
  }
  func.func @transform_0(%arg0: i32) -> (i32, i32) {
    %c0_i32 = arith.constant 0 : i32
    %c0_i32_0 = arith.constant 0 : i32
    return %arg0, %c0_i32 : i32, i32
  }
  func.func @transform_1(%arg0: i32) -> (i32, i32) {
    %c0_i32 = arith.constant 0 : i32
    %c0_i32_0 = arith.constant 0 : i32
    %c0_i32_1 = arith.constant 0 : i32
    return %c0_i32, %c0_i32_0 : i32, i32
  }
  func.func @transform_2(%arg0: i32) -> (i32, i32) {
    %c0_i32 = arith.constant 0 : i32
    %c0_i32_0 = arith.constant 0 : i32
    %c0_i32_1 = arith.constant 0 : i32
    return %c0_i32, %c0_i32_0 : i32, i32
  }
  func.func @transform_3(%arg0: i32) -> (i32, i32) {
    %c0_i32 = arith.constant 0 : i32
    %c0_i32_0 = arith.constant 0 : i32
    %c0_i32_1 = arith.constant 0 : i32
    return %c0_i32, %c0_i32_0 : i32, i32
  }
  func.func @transform_4(%arg0: i32) -> (i32, i32) {
    %c0_i32 = arith.constant 0 : i32
    %c0_i32_0 = arith.constant 0 : i32
    %c0_i32_1 = arith.constant 0 : i32
    return %c0_i32, %c0_i32_0 : i32, i32
  }
  func.func @transform_5(%arg0: i32) -> (i32, i32) {
    %c0_i32 = arith.constant 0 : i32
    %c0_i32_0 = arith.constant 0 : i32
    %c0_i32_1 = arith.constant 0 : i32
    return %c0_i32, %c0_i32_0 : i32, i32
  }
  func.func @transform_6(%arg0: i32) -> (i32, i32) {
    %c0_i32 = arith.constant 0 : i32
    %c0_i32_0 = arith.constant 0 : i32
    %c0_i32_1 = arith.constant 0 : i32
    return %c0_i32, %c0_i32_0 : i32, i32
  }
  func.func @transform_7(%arg0: i32) -> (i32, i32) {
    %c0_i32 = arith.constant 0 : i32
    %c0_i32_0 = arith.constant 0 : i32
    return %arg0, %c0_i32 : i32, i32
  }
}

</mosaic_0001>

<bundles_post_ra>
// kernel: trpo_actor_forward.1
= control target key start
LH: loop header
LB: loop body
LE: loop exit
PB: predicated region body
PF: predicated region fallthrough
CT: control target
= control target key end

     0   :  { %12 = vsyncpa [#allocation3], 0  ;;  %s569_s0 = inlined_call_operand.vmem [shape: f32[8,16], index: 0, kind: input, shape index: {}]   ;;  %s570_s1 = inlined_call_operand.hbm [shape: bf16[16,64], index: 1, kind: input, shape index: {}]   ;;  %s571_s2 = inlined_call_operand.vmem [shape: f32[1,64], index: 2, kind: input, shape index: {}]   ;;  %s572_s3 = inlined_call_operand.vmem [shape: bf16[64,64], index: 3, kind: input, shape index: {}]   ;;  %s573_s4 = inlined_call_operand.hbm [shape: f32[1,64], index: 4, kind: input, shape index: {}]   ;;  %s574_s5 = inlined_call_operand.vmem [shape: bf16[64,8], index: 5, kind: input, shape index: {}]   ;;  %s575_s6 = inlined_call_operand.hbm [shape: f32[1,8], index: 6, kind: input, shape index: {}]   ;;  %s576_s7 = inlined_call_operand.hbm [shape: f32[8,8], index: 7, kind: output, shape index: {}]  }
   0x1   :  { %13 = vsyncpa [#allocation6], 0 }
   0x2   :  { %14 = vsyncpa [#allocation4], 0  ;;  %s477_s24 = smov [#allocation5]   ;;  %s478_s26 = smov [#allocation2]  }
   0x3   :  { %s39_s25 = sshll.u32 %s477_s24, 4  ;;  %s22_s27 = sshll.u32 %s478_s26, 4  ;;  %s40_s25 = int_to_ptr.vmem [resolvable:$true] %s39_s25  ;;  %s23_s27 = int_to_ptr.vmem [resolvable:$true] %s22_s27 }
   0x4   :  { %s399_s28 = scalar_lea.vmem %s40_s25, 16  ;;  %s403_s29 = scalar_lea.vmem %s40_s25, 32 }
   0x5   :  { %p400_p0 = scmp.ne.s32.totalorder %s40_s25, %s399_s28  ;;  %p404_p1 = scmp.lt.s32.totalorder %s40_s25, %s40_s25 }
   0x6   :  { %p405_p2 = scmp.lt.s32.totalorder %s403_s29, %s399_s28 }
   0x8   :  { %p406_p3 = por %p405_p2, %p404_p1 }
   0xa   :  { %p407_p4 = pnand %p406_p3, %p400_p0 }
   0xc   :  { %410 = shalt.err (!%p407_p4)
}
   0xd   :  { %42 = dma.hbm_to_vmem [thread:$0]  %s573_s4, 16, %s40_s25, [#allocation6]  }
   0xe   :  { %s419_s9 = scalar_lea.vmem %s23_s27, 128  ;;  %p424_p6 = scmp.lt.s32.totalorder %s23_s27, %s23_s27 }
   0xf   :  { %p420_p5 = scmp.ne.s32.totalorder %s23_s27, %s419_s9  ;;  %p425_p7 = scmp.lt.s32.totalorder %s419_s9, %s419_s9 }
  0x11   :  { %p426_p8 = por %p425_p7, %p424_p6 }
  0x13   :  { %p427_p9 = pnand %p426_p8, %p420_p5 }
  0x15   :  { %430 = shalt.err (!%p427_p9)
}
  0x16   :  { %s479_s10 = smov 64   ;;  %s480_s11 = smov 4  }
  0x17   :  { %28 = dma.hbm_to_vmem [thread:$0]  %s570_s1, 128, %s23_s27, [#allocation3], %s479_s10, %s479_s10, %s480_s11  }
  0x18   :  { %s481_s14 = smov [#allocation7]  }
  0x19   :  { %s51_s15 = sshll.u32 %s481_s14, 4  ;;  %s52_s15 = int_to_ptr.vmem [resolvable:$true] %s51_s15 }
  0x1a   :  { %s439_s16 = scalar_lea.vmem %s52_s15, 16  ;;  %s443_s17 = scalar_lea.vmem %s52_s15, 32 }
  0x1b   :  { %p440_p10 = scmp.ne.s32.totalorder %s52_s15, %s439_s16  ;;  %p444_p11 = scmp.lt.s32.totalorder %s52_s15, %s52_s15 }
  0x1c   :  { %p445_p12 = scmp.lt.s32.totalorder %s443_s17, %s439_s16 }
  0x1e   :  { %p446_p13 = por %p445_p12, %p444_p11 }
  0x20   :  { %p447_p0 = pnand %p446_p13, %p440_p10 }
  0x22   :  { %450 = shalt.err (!%p447_p0)
}
  0x23   :  { %54 = dma.hbm_to_vmem [thread:$0]  %s575_s6, 16, %s52_s15, [#allocation6]  }
  0x24   :  { %471 = dma.done.wait [#allocation3], 128  }
  0x25   :  { %472 = vsyncadd [#allocation3], 4294967168 }
  0x26   :  { %473 = dma.done.wait [#allocation6], 32  }
  0x27   :  { %474 = vsyncadd [#allocation6], 4294967264  ;;  %v482_v0 = vmov 0.0   ;;  %vm483_vm0 = vmmov 0   ;;  %v378_v1 = vld [vmem:[#allocation2] sm:$0xff]   ;;  %vm82_vm1 = vcmask 130048  }
  0x28   :  { %340 = vmatprep.subr.bf16.mxu0 %v482_v0  ;;  %342 = vmatprep.mubr.msk.bf16.mxu0 %vm483_vm0, %v482_v0  ;;  %v65_v2 = vld [vmem:[%s569_s0] sm:$0xff]  ;;  %v379_v4 = vld [vmem:[%s572_s3 + $0x18] sm:$0xff]   ;;  %v380_v5 = vld [vmem:[%s572_s3 + $0x10] sm:$0xff]   ;;  %vm167_vm2 = vcmask 523264   ;;  %s484_s11 = smov [#allocation8]   ;;  %vm295_vm3 = vcmask 64512  }
  0x29   :  { %346 = vmatprep.subr.bf16.mxu1 %v482_v0  ;;  %354 = vmatprep.mubr.msk.bf16.mxu1 %vm483_vm0, %v482_v0  ;;  %v66_v3 = vpack.c.bf16 %v65_v2, %v65_v2  ;;  %v381_v6 = vld [vmem:[%s572_s3 + $0x8] sm:$0xff]   ;;  %v382_v7 = vld [vmem:[%s572_s3] sm:$0xff]   ;;  %v383_v16 = vld [vmem:[%s574_s5 + $0x18] sm:$0xff]   ;;  %s303_s12 = sshll.u32 %s484_s11, 4  ;;  %s304_s12 = int_to_ptr.vmem [resolvable:$true] %s303_s12 }
  0x2a   :  { %341 = vmatpush3.bf16.msra.mxu0 %v378_v1  ;;  %347 = vmatpush3.bf16.msra.mxu1 %v379_v4  ;;  %v313_v8 = vld [vmem:[%s571_s2] ss:$0 sm:$0xff]  ;;  %v384_v17 = vld [vmem:[%s574_s5 + $0x10] sm:$0xff]   ;;  %v385_v18 = vld [vmem:[%s574_s5 + $0x8] sm:$0xff]   ;;  %p456_p2 = scmp.lt.s32.totalorder %s304_s12, %s304_s12 }
  0x2b   :  { %358 = vmatprep.subr.bf16.mxu0 %v482_v0  ;;  %348 = vmatprep.subr.bf16.mxu1 %v482_v0  ;;  %v386_v19 = vld [vmem:[%s574_s5] sm:$0xff]   ;;  %v316_v20 = vld [vmem:[#allocation5] ss:$0 sm:$0xff]  ;;  %v322_v28 = vld [vmem:[#allocation7] ss:$0 sm:$0xff]  ;;  %s451_s5 = scalar_lea.vmem %s304_s12, 128 }
  0x2c   :  { %p452_p1 = scmp.ne.s32.totalorder %s304_s12, %s451_s5  ;;  %p457_p3 = scmp.lt.s32.totalorder %s451_s5, %s451_s5 }
  0x2d   :  { %343 = vmatmul.mubr.msk.bf16.vlgmr.msra.gmra.mxu0 %vm82_vm1, %v66_v3 }
  0x2e   :  { %366 = vmatprep.mubr.msk.bf16.mxu0 %vm483_vm0, %v482_v0  ;;  %349 = vmatpush3.bf16.msra.mxu1 %v380_v5  ;;  %p458_p4 = por %p457_p3, %p456_p2 }
  0x2f   :  { %350 = vmatprep.subr.bf16.mxu1 %v482_v0  ;;  %359 = vmatpush3.bf16.msra.mxu0 %v383_v16 }
  0x30   :  { %360 = vmatprep.subr.bf16.mxu0 %v482_v0  ;;  %p459_p5 = pnand %p458_p4, %p452_p1 }
  0x32   :  { %351 = vmatpush3.bf16.msra.mxu1 %v381_v6 }
  0x33   :  { %352 = vmatprep.subr.bf16.mxu1 %v482_v0  ;;  %361 = vmatpush3.bf16.msra.mxu0 %v384_v17 }
  0x34   :  { %362 = vmatprep.subr.bf16.mxu0 %v482_v0 }
  0x36   :  { %353 = vmatpush3.bf16.msra.mxu1 %v382_v7 }
  0x37   :  { %363 = vmatpush3.bf16.msra.mxu0 %v385_v18 }
  0x38   :  { %364 = vmatprep.subr.bf16.mxu0 %v482_v0 }
  0x3b   :  { %365 = vmatpush3.bf16.msra.mxu0 %v386_v19 }
  0xed   :  { %v120_v9 = vpop.f32.mrf.mxu0 }
  0xee   :  { %v121_v10 = vadd.f32 %v313_v8, %v120_v9 }
  0xef   :  { %v344_v11 = vpop.f32.mrf.mxu0 }
  0xf0   :  { %387 = vtanh.f32 %v121_v10 }
  0xf1   :  { %v123_v12 = vpop.f32.mrf.mxu0 }
  0xf3   :  { %v345_v13 = vpop.f32.mrf.mxu0 }
  0xfd   :  { %v388_v14 = vpop.eup %387 }
  0xfe   :  { %v127_v15 = vpack.c.bf16 %v388_v14, %v388_v14 }
 0x100   :  { %355 = vmatmul.mubr.msk.bf16.vlgmr.msra.gmra.mxu1 %vm167_vm2, %v127_v15 }
 0x1c0   :  { %v205_v21 = vpop.f32.mrf.mxu1 }
 0x1c1   :  { %v206_v22 = vadd.f32 %v316_v20, %v205_v21 }
 0x1c2   :  { %v356_v23 = vpop.f32.mrf.mxu1 }
 0x1c3   :  { %389 = vtanh.f32 %v206_v22 }
 0x1c4   :  { %v208_v24 = vpop.f32.mrf.mxu1 }
 0x1c6   :  { %v357_v25 = vpop.f32.mrf.mxu1 }
 0x1d0   :  { %v390_v26 = vpop.eup %389 }
 0x1d1   :  { %v212_v27 = vpack.c.bf16 %v390_v26, %v390_v26 }
 0x1d3   :  { %367 = vmatmul.mubr.msk.bf16.vlgmr.msra.gmra.mxu0 %vm167_vm2, %v212_v27 }
 0x293   :  { %v289_v29 = vpop.f32.mrf.mxu0 }
 0x294   :  { %v290_v30 = vadd.f32 %v322_v28, %v289_v29 }
 0x295   :  { %v368_v31 = vpop.f32.mrf.mxu0 }
 0x296   :  { %296 = vst.msk [vmem:[#allocation8] sm:$0xff] %vm295_vm3, %v290_v30 }
 0x297   :  { %v292_v32 = vpop.f32.mrf.mxu0 }
 0x298   :  { %462 = shalt.err (!%p459_p5)
}
 0x299   :  { %306 = dma.vmem_to_hbm [thread:$0]  %s304_s12, 128, %s576_s7, [#allocation4]   ;;  %v369_v33 = vpop.f32.mrf.mxu0 }
 0x29a   :  { %475 = dma.done.wait [#allocation4], 128  }
 0x29b   :  { %476 = vsyncadd [#allocation4], 4294967168 }
 0x29c   :  { %310 = vsyncpa [#allocation3], 1 }
 0x29d   :  { %311 = vsyncpa [#allocation6], 1 }
 0x29e   :  { %312 = vsyncpa [#allocation4], 1 }

</bundles_post_ra>
